<compile_context>
chip_gen: v7x
topology: tpu7x:2x2x1
jax: 0.10.0
libtpu: 0.0.40
codegen_flags: <defaults>
</compile_context>

<pallas_src>
from functools import lru_cache, partial

import jax
import jax.numpy as jnp
from jax.experimental import pallas as pl
from jax.experimental.pallas import tpu as pltpu


# ----------------------------------------------------------------------------
# One-time probe of pltpu.roll's rotation direction (cached).
# ----------------------------------------------------------------------------

@lru_cache(maxsize=None)
def _roll_moves_to_higher_indices() -> bool:
    """True iff pltpu.roll(x, s, axis) == jnp.roll(x, s, axis).

    Tiny (8, 128) probe kernel, run exactly once; keeps the main kernel
    correct regardless of the rotate convention of the installed Mosaic.
    """
    def probe(x_ref, o_ref):
        o_ref[...] = pltpu.roll(x_ref[...], 1, 1)

    x = jax.lax.broadcasted_iota(jnp.int32, (8, 128), 1)
    y = pl.pallas_call(
        probe, out_shape=jax.ShapeDtypeStruct((8, 128), jnp.int32))(x)
    return int(y[0, 0]) == 127          # np.roll convention: y[0] = x[-1]


# ----------------------------------------------------------------------------
# Pallas kernel
# ----------------------------------------------------------------------------

def _rope_kernel(q_ref, k_ref, tab_ref, qo_ref, ko_ref, *,
                 head_dim, rot, shift_plus, shift_minus):
    # Block shapes (after squeezing the batch dim):
    #   q_ref/k_ref/qo_ref/ko_ref : (H, L)   with L = seq_tile * head_dim
    #   tab_ref                   : (2, L)   row0=[cos,cos,1], row1=[-sin,sin,0]
    tab = tab_ref[...]
    cos_f = tab[0:1, :]                        # (1, L) broadcasts over heads
    sin_f = tab[1:2, :]                        # (1, L)
    h, L = q_ref.shape

    # Static channel index within each head_dim group (cheap VPU work, shared
    # by q and k).  first_half selects the x2 partner, else the x1 partner.
    chan = jax.lax.broadcasted_iota(jnp.int32, (h, L), 1) % head_dim
    first_half = chan < rot

    def rotate(x_ref, o_ref):
        x = x_ref[...].astype(jnp.float32)                 # (H, L)
        # Partner channels fetched via the XLU (free slot).  Wrap-around lanes
        # of the circular roll only land where sin_f == 0, so they never leak.
        x_plus = pltpu.roll(x, shift_plus, 1)              # x[j + rot]
        x_minus = pltpu.roll(x, shift_minus, 1)            # x[j - rot]
        swapped = jnp.where(first_half, x_plus, x_minus)
        # Single full-width, lane-dense store per output ref.
        o_ref[...] = (x * cos_f + swapped * sin_f).astype(o_ref.dtype)

    rotate(q_ref, qo_ref)
    rotate(k_ref, ko_ref)


# ----------------------------------------------------------------------------
# Pallas wrapper
# ----------------------------------------------------------------------------

def _pick_seq_tile(S, N, H, D, itemsize):
    """Largest sequence tile t dividing S whose flattened width t*D is a
    multiple of 128 lanes (or the full S*D) and whose live blocks
    (q, k, qo, ko + table) stay under ~12 MiB, i.e. <= ~24 MiB once
    double-buffered -- inside the scoped-VMEM limit on every generation."""
    budget = 12 << 20
    cands = [t for t in range(1, S + 1)
             if S % t == 0 and ((t * D) % 128 == 0 or t == S)]
    fitting = [t for t in cands
               if 4 * H * t * D * itemsize + 2 * t * D * 4 <= budget]
    pool = fitting if fitting else [min(cands)]
    # Prefer >= 2 grid steps so both v7x TensorCores / the DMA pipeline have
    # work; otherwise take the largest fitting tile.
    multi = [t for t in pool if N * (S // t) >= 2]
    return max(multi) if multi else max(pool)


def rope_apply(q, k, table, rot):
    """q, k: (N, H, S, D); table: (N, 2, S, D) f32 pre-extended cos/sin rows."""
    N, H, S, D = q.shape
    assert k.shape == (N, H, S, D)
    assert table.shape == (N, 2, S, D)
    assert 0 < rot and 2 * rot <= D

    ts = _pick_seq_tile(S, N, H, D, q.dtype.itemsize)
    L = ts * D
    grid = (N, S // ts)

    if _roll_moves_to_higher_indices():
        shift_plus, shift_minus = L - rot, rot     # roll(x, L-rot)[j] = x[j+rot]
    else:
        shift_plus, shift_minus = rot, L - rot

    # Free reshapes: collapse the contiguous trailing (S, D) dims into a
    # lane-dense axis; no data movement.
    qf = q.reshape(N, H, S * D)
    kf = k.reshape(N, H, S * D)
    tf = table.reshape(N, 2, S * D)

    qk_spec = pl.BlockSpec((None, H, L), lambda n, s: (n, 0, s))
    tab_spec = pl.BlockSpec((None, 2, L), lambda n, s: (n, 0, s))

    qo, ko = pl.pallas_call(
        partial(_rope_kernel, head_dim=D, rot=rot,
                shift_plus=shift_plus, shift_minus=shift_minus),
        out_shape=(jax.ShapeDtypeStruct((N, H, S * D), q.dtype),
                   jax.ShapeDtypeStruct((N, H, S * D), k.dtype)),
        grid=grid,
        in_specs=[qk_spec, qk_spec, tab_spec],
        out_specs=(qk_spec, qk_spec),
        compiler_params=pltpu.CompilerParams(
            dimension_semantics=("parallel", "parallel"),
            vmem_limit_bytes=32 * 1024 * 1024),
    )(qf, kf, tf)

    return qo.reshape(N, H, S, D), ko.reshape(N, H, S, D)


# ----------------------------------------------------------------------------
# JAX glue replicating the module's buffer / cos-sin construction
# ----------------------------------------------------------------------------

def rope_freqs(rot_dim, pos_dim=1, theta=10000.0):
    n_freq = rot_dim // (pos_dim * 2)
    return theta ** jnp.linspace(0.0, -1.0, n_freq + 1)[:-1]            # (F,)


def make_pos(*shape):
    ranges = [jnp.arange(s) for s in shape]
    pos = jnp.stack(jnp.meshgrid(*ranges, indexing="ij"), axis=-1)
    return pos.reshape(-1, len(shape))                                  # (prod, ndim)


def make_cos_sin(pos, freqs):
    # pos: (N, S, P) ; freqs: (F,)  ->  cos, sin: (N, 1, S, P*F)
    # TODO(synk): the PyTorch lru_cache on make_cos_sin is subsumed by jit
    # tracing/caching; the tiny table is recomputed per call under jit.
    tmp = pos[..., None].astype(jnp.float32) * freqs.astype(jnp.float32)  # (N,S,P,F)
    tmp = tmp.reshape(*tmp.shape[:-2], tmp.shape[-2] * tmp.shape[-1])     # (N,S,P*F)
    tmp = jnp.expand_dims(tmp, 1)                                         # (N,1,S,P*F)
    return jnp.cos(tmp), jnp.sin(tmp)


def make_rope_table(pos, freqs, head_dim):
    """Merged, pre-extended table of shape (N, 2, S, D).

    Per token, over the channel axis of width D (rot = rotated half-width):
      row 0: [ cos, cos, 1 ]   multiplies x[j]
      row 1: [-sin, sin, 0 ]   multiplies the x1<->x2 partner of x[j]
    so the kernel emits a single lane-dense store per output tile and the
    tail channels pass through via the 1/0 padding.
    """
    cos, sin = make_cos_sin(pos, freqs)          # (N, 1, S, r)
    cos, sin = cos[:, 0], sin[:, 0]              # (N, S, r)
    N, S, r = cos.shape
    assert r > 0 and 2 * r <= head_dim
    tail = head_dim - 2 * r
    ones_t = jnp.ones((N, S, tail), jnp.float32)
    zeros_t = jnp.zeros((N, S, tail), jnp.float32)
    cos_full = jnp.concatenate([cos, cos, ones_t], axis=-1)      # (N, S, D)
    sin_full = jnp.concatenate([-sin, sin, zeros_t], axis=-1)    # (N, S, D)
    return jnp.stack([cos_full, sin_full], axis=1), r            # (N, 2, S, D)


def rope_forward(pos, q, k, freqs):
    table, rot = make_rope_table(pos, freqs, q.shape[-1])
    return rope_apply(q, k, table, rot)


# ----------------------------------------------------------------------------
# Pure-JAX reference (mirror of the PyTorch math) for correctness checking
# ----------------------------------------------------------------------------

def rope_reference(pos, q, k, freqs):
    cos, sin = make_cos_sin(pos, freqs)

    def rot(x):
        r = cos.shape[-1]
        x1, x2, x3 = x[..., :r], x[..., r:2 * r], x[..., 2 * r:]
        y1 = x1 * cos - x2 * sin
        y2 = x2 * cos + x1 * sin
        return jnp.concatenate(
            [y1.astype(x3.dtype), y2.astype(x3.dtype), x3], axis=-1)

    return rot(q), rot(k)


# ----------------------------------------------------------------------------
# Main
# ----------------------------------------------------------------------------

if __name__ == "__main__":
    N, H = 2, 4            # batch, heads
    HS, WS = 4, 4          # 2-D token grid -> S = 16, pos_dim = 2
    S = HS * WS
    D = 64                 # head_dim
    ROT_DIM = 32           # rotated channels; remaining D - ROT_DIM pass through
    POS_DIM = 2
    THETA = 10000.0

    key = jax.random.PRNGKey(0)
    kq, kk = jax.random.split(key)
    q = jax.random.normal(kq, (N, H, S, D), jnp.float32)
    k = jax.random.normal(kk, (N, H, S, D), jnp.float32)

    pos1 = make_pos(HS, WS)                                  # (S, 2) int32
    pos = jnp.broadcast_to(pos1[None], (N, S, POS_DIM))      # (N, S, 2)
    freqs = rope_freqs(ROT_DIM, POS_DIM, THETA)              # (ROT_DIM // (POS_DIM*2),)

    # Pre-warm the one-time roll-direction probe outside of jit tracing.
    _roll_moves_to_higher_indices()

    fwd = jax.jit(rope_forward)
    q_rot, k_rot = fwd(pos, q, k, freqs)
    jax.block_until_ready((q_rot, k_rot))

    q_ref, k_ref = rope_reference(pos, q, k, freqs)

    assert q_rot.shape == q.shape and k_rot.shape == k.shape
    assert q_rot.dtype == q.dtype and k_rot.dtype == k.dtype
    assert bool(jnp.all(jnp.isfinite(q_rot))) and bool(jnp.all(jnp.isfinite(k_rot)))
    assert bool(jnp.allclose(q_rot, q_ref, atol=1e-5, rtol=1e-5))
    assert bool(jnp.allclose(k_rot, k_ref, atol=1e-5, rtol=1e-5))
    print("KERNEL_OK")
</pallas_src>

<mosaic_0001>
module attributes {stable_mosaic.version = 11 : i64} {
  func.func @probe(%arg0: memref<8x128xi32, #tpu.memory_space<vmem>>, %arg1: memref<8x128xi32, #tpu.memory_space<vmem>>) attributes {dimension_semantics = [], scalar_prefetch = 0 : i64, scratch_operands = 0 : i64, tpu.core_type = #tpu.core_type<tc>} {
    %c0 = arith.constant 0 : index
    %c0_0 = arith.constant 0 : index
    %0 = vector.load %arg0[%c0, %c0_0] : memref<8x128xi32, #tpu.memory_space<vmem>>, vector<8x128xi32>
    %c1_i32 = arith.constant 1 : i32
    %1 = tpu.dynamic_rotate %0 by %c1_i32 dim 1 : vector<8x128xi32>, i32 -> vector<8x128xi32>
    %c0_1 = arith.constant 0 : index
    %c0_2 = arith.constant 0 : index
    %2 = vector.load %arg1[%c0_1, %c0_2] : memref<8x128xi32, #tpu.memory_space<vmem>>, vector<8x128xi32>
    tpu.vector_store %arg1[%c0_1, %c0_2], %1 {strides = array<i32>} : memref<8x128xi32, #tpu.memory_space<vmem>>, vector<8x128xi32>,
    return
  }
}

</mosaic_0001>

<bundles_post_ra>
// kernel: tpu_custom_call.1
= control target key start
LH: loop header
LB: loop body
LE: loop exit
PB: predicated region body
PF: predicated region fallthrough
CT: control target
= control target key end

     0   :  { %6 = vsyncpa [#allocation3], 0  ;;  %s128_s0 = inlined_call_operand.hbm [shape: s32[8,128], index: 0, kind: input, shape index: {}]   ;;  %s129_s1 = inlined_call_operand.hbm [shape: s32[8,128], index: 1, kind: output, shape index: {}]  }
   0x1   :  { %7 = vsyncpa [#allocation4], 0  ;;  %s91_s6 = smov [#allocation2]   ;;  %s43_s10 = scalar_lea.hbm %s128_s0, 128 }
   0x2   :  { %s14_s7 = sshll.u32 %s91_s6, 4  ;;  %p44_p0 = scmp.ne.s32.totalorder %s128_s0, %s43_s10  ;;  %s15_s7 = int_to_ptr.vmem [resolvable:$true] %s14_s7 }
   0x3   :  { %p47_p1 = scmp.lt.u32.totalorder %s43_s10, %s128_s0 }
   0x5   :  { %p49_p2 = pnand %p47_p1, %p44_p0 }
   0x7   :  { %52 = shalt.err (!%p49_p2)
}
   0x8   :  { %s53_s15 = scalar_lea.vmem %s15_s7, 128  ;;  %p58_p4 = scmp.lt.s32.totalorder %s15_s7, %s15_s7 }
   0x9   :  { %p54_p3 = scmp.ne.s32.totalorder %s15_s7, %s53_s15  ;;  %p59_p5 = scmp.lt.s32.totalorder %s53_s15, %s53_s15 }
   0xb   :  { %p60_p6 = por %p59_p5, %p58_p4 }
   0xd   :  { %p61_p7 = pnand %p60_p6, %p54_p3 }
   0xf   :  { %64 = shalt.err (!%p61_p7)
}
  0x10   :  { %17 = dma.hbm_to_vmem [thread:$0]  %s128_s0, 128, %s15_s7, [#allocation3]  }
  0x11   :  { %87 = dma.done.wait [#allocation3], 128  }
  0x12   :  { %88 = vsyncadd [#allocation3], 4294967168  ;;  %v21_v0 = vld [vmem:[#allocation2] sm:$0xff]  ;;  %s92_s18 = smov 1   ;;  %s93_s19 = smov [#allocation5]  }
  0x13   :  { %22 = vrot.lane.b32.xlu0 %v21_v0, %s92_s18  ;;  %s31_s20 = sshll.u32 %s93_s19, 4  ;;  %s32_s20 = int_to_ptr.vmem [resolvable:$true] %s31_s20 }
  0x14   :  { %s65_s21 = scalar_lea.vmem %s32_s20, 128  ;;  %p70_p9 = scmp.lt.s32.totalorder %s32_s20, %s32_s20 }
  0x15   :  { %p66_p8 = scmp.ne.s32.totalorder %s32_s20, %s65_s21  ;;  %p71_p10 = scmp.lt.s32.totalorder %s65_s21, %s65_s21 }
  0x17   :  { %p72_p11 = por %p71_p10, %p70_p9 }
  0x19   :  { %p73_p12 = pnand %p72_p11, %p66_p8 }
  0x85   :  { %v23_v1 = vpop.permute.xlu0 %22 }
  0x86   :  { %24 = vst [vmem:[#allocation5] sm:$0xff] %v23_v1 }
  0x87   :  { %76 = shalt.err (!%p73_p12)
}
  0x88   :  { %s77_s0 = scalar_lea.hbm %s129_s1, 128 }
  0x89   :  { %p78_p13 = scmp.ne.s32.totalorder %s129_s1, %s77_s0  ;;  %p81_p0 = scmp.lt.u32.totalorder %s77_s0, %s129_s1 }
  0x8b   :  { %p83_p1 = pnand %p81_p0, %p78_p13 }
  0x8d   :  { %86 = shalt.err (!%p83_p1)
}
  0x8e   :  { %34 = dma.vmem_to_hbm [thread:$0]  %s32_s20, 128, %s129_s1, [#allocation4]  }
  0x8f   :  { %89 = dma.done.wait [#allocation4], 128  }
  0x90   :  { %90 = vsyncadd [#allocation4], 4294967168 }
  0x91   :  { %38 = vsyncpa [#allocation3], 1 }
  0x92   :  { %39 = vsyncpa [#allocation4], 1 }

</bundles_post_ra>
